<compile_context>
chip_gen: v7x
topology: tpu7x:2x2x1
jax: 0.10.0
libtpu: 0.0.40
codegen_flags: <defaults>
</compile_context>

<pallas_src>
import math
from functools import partial

import jax
import jax.numpy as jnp
from jax import lax
from jax.experimental import pallas as pl
from jax.experimental.pallas import tpu as pltpu

_NEG = -1e30  # large finite negative for masking (avoids inf-inf -> NaN)


# ---------------------------------------------------------------------------
# Kernel 1: QKV projection   (TQ, C) @ (C, 3C) + (1, 3C)
# ---------------------------------------------------------------------------
def _qkv_proj_kernel(x_ref, w_ref, b_ref, o_ref):
    x = x_ref[0]                                                    # (TQ, C)
    y = jnp.dot(x, w_ref[...], preferred_element_type=jnp.float32) + b_ref[...]
    o_ref[0] = y.astype(o_ref.dtype)


# ---------------------------------------------------------------------------
# Kernel 2: flash causal attention + output projection (fused epilogue)
# ---------------------------------------------------------------------------
def _flash_attn_proj_kernel(qkv_ref, wproj_ref, bproj_ref, o_ref, *, n_head, tq):
    qi = pl.program_id(1)                 # query-tile index
    C3 = qkv_ref.shape[2]
    C = C3 // 3
    H = n_head
    D = C // H
    tk = tq                               # KV tile size == query tile size
    scale = 1.0 / math.sqrt(D)
    cdt = qkv_ref.dtype                   # MXU operand dtype (bf16 if inputs bf16)
    wdt = wproj_ref.dtype

    # ----- query tile (loaded once, pre-scaled, head-sliced outside the loop)
    q_start = pl.multiple_of(qi * tq, tq)
    q_all = qkv_ref[0, pl.ds(q_start, tq), pl.ds(0, C)]             # (tq, C)
    q_all = (q_all.astype(jnp.float32) * scale).astype(cdt)
    q_heads = [q_all[:, h * D:(h + 1) * D] for h in range(H)]       # H x (tq, D)

    # ----- per-tile triangular mask (only needed on the diagonal KV tile)
    row = lax.broadcasted_iota(jnp.int32, (tq, tk), 0)
    col = lax.broadcasted_iota(jnp.int32, (tq, tk), 1)
    tri = col <= row                                                # (tq, tk)

    # ----- online-softmax (flash) state per head, carried through the KV loop
    ms = tuple(jnp.full((tq, 1), _NEG, dtype=jnp.float32) for _ in range(H))
    ls = tuple(jnp.zeros((tq, 1), dtype=jnp.float32) for _ in range(H))
    accs = tuple(jnp.zeros((tq, D), dtype=jnp.float32) for _ in range(H))

    def kv_step(j, carry):
        ms, ls, accs = carry
        kv_start = pl.multiple_of(j * tk, tk)
        k_all = qkv_ref[0, pl.ds(kv_start, tk), pl.ds(C, C)]        # (tk, C)
        v_all = qkv_ref[0, pl.ds(kv_start, tk), pl.ds(2 * C, C)]    # (tk, C)
        # off-diagonal tiles (j < qi) are fully valid; mask only the diagonal.
        valid = jnp.logical_or(j < qi, tri)                         # (tq, tk)

        new_ms, new_ls, new_accs = [], [], []
        for h in range(H):                                          # static unroll
            kh = k_all[:, h * D:(h + 1) * D]                        # (tk, D)
            vh = v_all[:, h * D:(h + 1) * D]                        # (tk, D)
            # contract last dims -> no materialized transpose of K
            s = lax.dot_general(q_heads[h], kh, (((1,), (1,)), ((), ())),
                                preferred_element_type=jnp.float32)  # (tq, tk)
            s = jnp.where(valid, s, _NEG)
            m_new = jnp.maximum(ms[h], jnp.max(s, axis=-1, keepdims=True))
            alpha = jnp.exp(ms[h] - m_new)
            p = jnp.exp(s - m_new)
            l_new = alpha * ls[h] + jnp.sum(p, axis=-1, keepdims=True)
            acc_new = alpha * accs[h] + jnp.dot(p.astype(cdt), vh,
                                                preferred_element_type=jnp.float32)
            new_ms.append(m_new)
            new_ls.append(l_new)
            new_accs.append(acc_new)
        return tuple(new_ms), tuple(new_ls), tuple(new_accs)

    # causal skip: only KV tiles 0..qi are ever touched
    ms, ls, accs = lax.fori_loop(0, qi + 1, kv_step, (ms, ls, accs))

    # ----- epilogue: normalize + per-head projection accumulation (no concat)
    y = jnp.zeros((tq, C), dtype=jnp.float32)
    for h in range(H):
        o_h = accs[h] * pl.reciprocal(ls[h], approx=True)           # (tq, D)
        y = y + jnp.dot(o_h.astype(wdt), wproj_ref[h * D:(h + 1) * D, :],
                        preferred_element_type=jnp.float32)
    y = y + bproj_ref[...]
    o_ref[0] = y.astype(o_ref.dtype)


# ---------------------------------------------------------------------------
# Wrapper
# ---------------------------------------------------------------------------
def causal_self_attention(x, wqkv, bqkv, wproj, bproj, *, n_head, block_q=128):
    B, T, C = x.shape
    assert C % n_head == 0
    tq = min(block_q, T)
    assert T % tq == 0, "sequence length must be divisible by the query tile"
    n_t = T // tq

    cparams = pltpu.CompilerParams(
        dimension_semantics=("parallel", "parallel"),
        vmem_limit_bytes=32 * 1024 * 1024,   # explicit; re-derive tiles for v7x
    )

    # ---- kernel 1: QKV projection ------------------------------------------
    qkv = pl.pallas_call(
        _qkv_proj_kernel,
        out_shape=jax.ShapeDtypeStruct((B, T, 3 * C), x.dtype),
        grid_spec=pltpu.PrefetchScalarGridSpec(
            num_scalar_prefetch=0,
            grid=(B, n_t),
            in_specs=[
                pl.BlockSpec((1, tq, C), lambda b, i: (b, i, 0)),      # x tile
                pl.BlockSpec((C, 3 * C), lambda b, i: (0, 0)),         # Wqkv (resident)
                pl.BlockSpec((1, 3 * C), lambda b, i: (0, 0)),         # bqkv (resident)
            ],
            out_specs=pl.BlockSpec((1, tq, 3 * C), lambda b, i: (b, i, 0)),
        ),
        compiler_params=cparams,
    )(x, wqkv, bqkv)

    # ---- kernel 2: flash attention + output projection ----------------------
    kernel = partial(_flash_attn_proj_kernel, n_head=n_head, tq=tq)
    out = pl.pallas_call(
        kernel,
        out_shape=jax.ShapeDtypeStruct((B, T, C), x.dtype),
        grid_spec=pltpu.PrefetchScalarGridSpec(
            num_scalar_prefetch=0,
            grid=(B, n_t),
            in_specs=[
                # full-sequence QKV slab per batch; index ignores qi so it is
                # DMA'd once per batch element and stays resident across q-tiles
                pl.BlockSpec((1, T, 3 * C), lambda b, qi: (b, 0, 0)),
                pl.BlockSpec((C, C), lambda b, qi: (0, 0)),            # Wproj
                pl.BlockSpec((1, C), lambda b, qi: (0, 0)),            # bproj
            ],
            out_specs=pl.BlockSpec((1, tq, C), lambda b, qi: (b, qi, 0)),
        ),
        compiler_params=cparams,
    )(qkv, wproj, bproj)
    return out


# ---------------------------------------------------------------------------
# Pure-JAX reference (mirrors the PyTorch forward)
# ---------------------------------------------------------------------------
def reference(x, wqkv, bqkv, wproj, bproj, n_head):
    B, T, C = x.shape
    D = C // n_head
    qkv = x @ wqkv + bqkv
    q, k, v = jnp.split(qkv, 3, axis=-1)
    q = q.reshape(B, T, n_head, D).transpose(0, 2, 1, 3)
    k = k.reshape(B, T, n_head, D).transpose(0, 2, 1, 3)
    v = v.reshape(B, T, n_head, D).transpose(0, 2, 1, 3)
    s = jnp.einsum("bhtd,bhsd->bhts", q, k) / math.sqrt(D)
    mask = jnp.tril(jnp.ones((T, T), dtype=bool))
    s = jnp.where(mask, s, -jnp.inf)
    p = jax.nn.softmax(s, axis=-1)
    y = jnp.einsum("bhts,bhsd->bhtd", p, v)
    y = y.transpose(0, 2, 1, 3).reshape(B, T, C)
    return y @ wproj + bproj


if __name__ == "__main__":
    def make_inputs(B, T, C, seed=0):
        key = jax.random.PRNGKey(seed)
        k_x, k_wq, k_bq, k_wp, k_bp = jax.random.split(key, 5)
        x = jax.random.normal(k_x, (B, T, C), dtype=jnp.float32)
        wqkv = jax.random.normal(k_wq, (C, 3 * C), dtype=jnp.float32) / math.sqrt(C)
        bqkv = jax.random.normal(k_bq, (1, 3 * C), dtype=jnp.float32) * 0.02
        wproj = jax.random.normal(k_wp, (C, C), dtype=jnp.float32) / math.sqrt(C)
        bproj = jax.random.normal(k_bp, (1, C), dtype=jnp.float32) * 0.02
        return x, wqkv, bqkv, wproj, bproj

    # tolerance accounts for pl.reciprocal(approx=True) in the softmax epilogue
    TOL = 2e-2

    # Config 1: single query tile (T == TQ)
    B, T, C, H = 2, 8, 32, 4
    x, wqkv, bqkv, wproj, bproj = make_inputs(B, T, C, seed=0)
    out = causal_self_attention(x, wqkv, bqkv, wproj, bproj, n_head=H)
    out = jax.block_until_ready(out)
    ref = reference(x, wqkv, bqkv.reshape(3 * C), wproj, bproj.reshape(C), H)
    assert out.shape == (B, T, C)
    assert jnp.allclose(out, ref, atol=TOL, rtol=TOL), "mismatch (single tile)"

    # Config 2: multiple query/KV tiles -> exercises the online-softmax loop
    # and the causal tile skipping (block_q=8 -> 4 query tiles).
    B, T, C, H = 2, 32, 32, 4
    x, wqkv, bqkv, wproj, bproj = make_inputs(B, T, C, seed=1)
    out = causal_self_attention(x, wqkv, bqkv, wproj, bproj, n_head=H, block_q=8)
    out = jax.block_until_ready(out)
    ref = reference(x, wqkv, bqkv.reshape(3 * C), wproj, bproj.reshape(C), H)
    assert out.shape == (B, T, C)
    assert jnp.allclose(out, ref, atol=TOL, rtol=TOL), "mismatch (tiled/flash)"

    print("KERNEL_OK")
</pallas_src>

<mosaic_0001>
module attributes {stable_mosaic.version = 11 : i64} {
  func.func @_qkv_proj_kernel(%arg0: i32, %arg1: i32, %arg2: memref<1x8x32xf32, #tpu.memory_space<vmem>>, %arg3: memref<32x96xf32, #tpu.memory_space<vmem>>, %arg4: memref<1x96xf32, #tpu.memory_space<vmem>>, %arg5: memref<1x8x96xf32, #tpu.memory_space<vmem>>) attributes {dimension_semantics = [#tpu.dimension_semantics<parallel>, #tpu.dimension_semantics<parallel>], iteration_bounds = array<i64: 2, 1>, scalar_prefetch = 0 : i64, scratch_operands = 0 : i64, tpu.core_type = #tpu.core_type<tc>, window_params = [{transform_indices = @transform_0, window_bounds = array<i64: 1, 8, 32>}, {pipeline_mode = #tpu.pipeline_mode<synchronous>, transform_indices = @transform_1, window_bounds = array<i64: 32, 96>}, {pipeline_mode = #tpu.pipeline_mode<synchronous>, transform_indices = @transform_2, window_bounds = array<i64: 1, 96>}, {transform_indices = @transform_3, window_bounds = array<i64: 1, 8, 96>}]} {
    %c0 = arith.constant 0 : index
    %c0_0 = arith.constant 0 : index
    %c0_1 = arith.constant 0 : index
    %0 = vector.load %arg2[%c0, %c0_0, %c0_1] : memref<1x8x32xf32, #tpu.memory_space<vmem>>, vector<1x8x32xf32>
    %1 = vector.shape_cast %0 : vector<1x8x32xf32> to vector<8x32xf32>
    %c0_2 = arith.constant 0 : index
    %c0_3 = arith.constant 0 : index
    %2 = vector.load %arg3[%c0_2, %c0_3] : memref<32x96xf32, #tpu.memory_space<vmem>>, vector<32x96xf32>
    %cst = arith.constant dense<0.000000e+00> : vector<8x96xf32>
    %3 = tpu.matmul %1, %2, %cst {dimension_numbers = #tpu.dot_dimension_numbers<[1], [0], [0], [1], [0, 0, 1, 1], [], []>} : vector<8x32xf32>, vector<32x96xf32>, vector<8x96xf32> -> vector<8x96xf32>
    %c0_4 = arith.constant 0 : index
    %c0_5 = arith.constant 0 : index
    %4 = vector.load %arg4[%c0_4, %c0_5] : memref<1x96xf32, #tpu.memory_space<vmem>>, vector<1x96xf32>
    %5 = vector.broadcast %4 : vector<1x96xf32> to vector<8x96xf32>
    %6 = arith.addf %3, %5 : vector<8x96xf32>
    %c0_6 = arith.constant 0 : index
    %c0_7 = arith.constant 0 : index
    %c0_8 = arith.constant 0 : index
    %7 = vector.load %arg5[%c0_6, %c0_7, %c0_8] : memref<1x8x96xf32, #tpu.memory_space<vmem>>, vector<1x8x96xf32>
    %8 = vector.shape_cast %7 : vector<1x8x96xf32> to vector<8x96xf32>
    %9 = vector.shape_cast %6 : vector<8x96xf32> to vector<1x8x96xf32>
    tpu.vector_store %arg5[%c0_6, %c0_7, %c0_8], %9 {strides = array<i32>} : memref<1x8x96xf32, #tpu.memory_space<vmem>>, vector<1x8x96xf32>,
    return
  }
  func.func @transform_0(%arg0: i32, %arg1: i32) -> (i32, i32, i32) {
    %c0_i32 = arith.constant 0 : i32
    %c0_i32_0 = arith.constant 0 : i32
    return %arg0, %arg1, %c0_i32 : i32, i32, i32
  }
  func.func @transform_1(%arg0: i32, %arg1: i32) -> (i32, i32) {
    %c0_i32 = arith.constant 0 : i32
    %c0_i32_0 = arith.constant 0 : i32
    %c0_i32_1 = arith.constant 0 : i32
    return %c0_i32, %c0_i32_0 : i32, i32
  }
  func.func @transform_2(%arg0: i32, %arg1: i32) -> (i32, i32) {
    %c0_i32 = arith.constant 0 : i32
    %c0_i32_0 = arith.constant 0 : i32
    %c0_i32_1 = arith.constant 0 : i32
    return %c0_i32, %c0_i32_0 : i32, i32
  }
  func.func @transform_3(%arg0: i32, %arg1: i32) -> (i32, i32, i32) {
    %c0_i32 = arith.constant 0 : i32
    %c0_i32_0 = arith.constant 0 : i32
    return %arg0, %arg1, %c0_i32 : i32, i32, i32
  }
}

</mosaic_0001>

<bundles_post_ra>
// kernel: tpu_custom_call.1
= control target key start
LH: loop header
LB: loop body
LE: loop exit
PB: predicated region body
PF: predicated region fallthrough
CT: control target
= control target key end

     0   :  { %8 = vsyncpa [#allocation3], 0  ;;  %s919_s0 = inlined_call_operand.hbm [shape: f32[2,8,32], index: 0, kind: input, shape index: {}]   ;;  %s920_s1 = inlined_call_operand.hbm [shape: f32[32,96], index: 1, kind: input, shape index: {}]   ;;  %s921_s2 = inlined_call_operand.vmem [shape: f32[1,96], index: 2, kind: input, shape index: {}]   ;;  %s922_s3 = inlined_call_operand.hbm [shape: f32[2,8,96], index: 3, kind: output, shape index: {}]  }
   0x1   :  { %10 = vsyncpa [#allocation3 + $0x1], 0 }
   0x2   :  { %11 = vsyncpa [#allocation6], 0 }
   0x3   :  { %12 = vsyncpa [#allocation4], 0 }
   0x4   :  { %14 = vsyncpa [#allocation4 + $0x1], 0  ;;  %s702_s12 = smov 0   ;;  %s704_s13 = smov 0  }
   0x5   :  { %s706_s14 = smov 0   ;;  %s708_s15 = smov 0  }
   0x6   :  { %s710_s16 = smov 0   ;;  %s712_s17 = smov 0  }
   0x7 LB: > { %s411_s18 = sadd.s32 4294967295, %s672_s17   ;;  %s412_s19 = sadd.s32 4294967294, %s672_s17   ;;  %s672_s17 = sphi %s712_s17, %s20_s17   ;;  %s668_s16 = sphi %s710_s16, %s946_s16   ;;  %s664_s15 = sphi %s708_s15, %s945_s15   ;;  %s660_s14 = sphi %s706_s14, %s944_s14   ;;  %s656_s13 = sphi %s704_s13, %s943_s13   ;;  %s652_s12 = sphi %s702_s12, %s942_s12  }
   0x8   : > { %p54_p0 = scmp.ne.s32.totalorder %s656_s13, %s652_s12  ;;  %p736_p1 = scmp.eq.s32.totalorder %s411_s18, 0 }
   0x9   : > { %p740_p2 = scmp.eq.s32.totalorder %s411_s18, 1  ;;  %p128_p3 = scmp.eq.s32.totalorder %s412_s19, 1 }
   0xa   : > { %s927_s20 = scalar_select %p736_p1, 1, 0 }
   0xb   : > { %s928_s21 = scalar_select %p740_p2, 1, 0 }
   0xc   : > { %p746_p4 = por %p736_p1, %p54_p0  ;;  %p413_p5 = scmp.ge.s32.totalorder %s672_s17, 1 }
   0xd   : > { %p751_p6 = por %p128_p3, %p54_p0  ;;  %p135_p7 = scmp.lt.s32.totalorder %s672_s17, 3 }
   0xe   : > { %s929_s22 = scalar_select %p746_p4, 1, 0 }
   0xf   : > { %s930_s23 = scalar_select %p751_p6, 1, 0 }
  0x10   : > { %p756_p8 = pnand %p413_p5, %p135_p7  ;;  %s674_s25 = smov [#allocation5]  }
  0x11   : > { %s147_s26 = sshll.u32 %s674_s25, 4  ;;  %s32_s28 = sadd.s32 1, %s668_s16  ;;  %s148_s26 = int_to_ptr.vmem [resolvable:$true] %s147_s26 }
  0x12   : > { %s931_s24 = scalar_select %p756_p8, 1, 0 }
  0x13   : > { %p458_p9 = pneg %p756_p8  ;;  %s528_s4 = scalar_lea.hbm %s920_s1, 512 }
  0x14   : > { %p529_p12 = scmp.ne.s32.totalorder %s920_s1, %s528_s4  ;;  %p535_p5 = scmp.lt.u32.totalorder %s528_s4, %s920_s1 }
  0x15   : > { %p765_p11 = pnand %p458_p9, %p736_p1 }
  0x17   : > { %p530_p13 = pneg %p765_p11 }
  0x19   : > { %p531_p0 = pnand %p530_p13, %p529_p12 }
  0x1b   : > { %p532_p3 = pneg %p531_p0 }
  0x1d   : > { %p537_p7 = pnand %p535_p5, %p532_p3 }
  0x1f   : > { %540 = shalt.err (!%p537_p7)
}
  0x20   : > { %s541_s9 = scalar_lea.vmem %s148_s26, 512  ;;  %p549_p1 = scmp.lt.s32.totalorder %s148_s26, %s148_s26 }
  0x21   : > { %p542_p9 = scmp.ne.s32.totalorder %s148_s26, %s541_s9  ;;  %p550_p4 = scmp.lt.s32.totalorder %s541_s9, %s541_s9 }
  0x23   : > { %p544_p10 = pnand %p542_p9, %p530_p13  ;;  %p551_p8 = por %p550_p4, %p549_p1 }
  0x25   : > { %p545_p6 = pneg %p544_p10 }
  0x27   : > { %p552_p2 = pnand %p551_p8, %p545_p6 }
  0x29   : > { %555 = shalt.err (!%p552_p2)
}
  0x2a   : > { %s675_s10 = smov 128   ;;  %s676_s11 = smov 8  }
  0x2b   : > { %461 = dma.hbm_to_vmem [thread:$0]  (!%p765_p11), %s920_s1, 512, %s148_s26, [#allocation6], %s675_s10, %s675_s10, %s676_s11  }
  0x2c   : > { %p34_p1 = scmp.ge.s32.totalorder %s32_s28, 2  ;;  %s41_s25 = sadd.s32 1, %s660_s14 }
  0x2d   : > { %p48_p2 = scmp.ne.s32.totalorder %s660_s14, %s656_s13  ;;  %p49_p4 = scmp.eq.s32.totalorder %s672_s17, 0 }
  0x2e   : > { %s948_s28 = smov (%p34_p1, %s32_s28), 0  ;;  %p934_p8 = scmp.ne.s32.totalorder %s928_s21, 0 }
  0x2f   : > { %p792_p6 = por %p49_p4, %p48_p2  ;;  %s36_s27 = ssub.s32 %s668_s16, %s948_s28 }
  0x30   : > { %p798_p10 = por %p934_p8, %p48_p2  ;;  %p471_p12 = scmp.lt.s32.totalorder %s672_s17, 2 }
  0x31   : > { %p39_p11 = scmp.eq.s32.totalorder %s36_s27, 0  ;;  %s164_s26 = sand.u32 1, %s660_s14  }
  0x32   : > { %s416_s4 = sshll.u32 %s164_s26, 3  ;;  %s417_s6 = sshll.u32 %s668_s16, 7 }
  0x33   : > { %s807_s5 = scalar_select %p39_p11, %s660_s14, %s41_s25  }
  0x34   : > { %s813_s9 = scalar_lea.hbm %s919_s0, %s417_s6  ;;  %s168_s21 = scalar_lea.vmem [#allocation2], %s416_s4 }
  0x35   : > { %s176_s10 = sshll.u32 %s168_s21, 4  ;;  %p819_p13 = pnand %p471_p12, %p792_p6  ;;  %s815_s10 = int_to_ptr.vmem [resolvable:$true] %s176_s10 }
  0x36   : > { %s165_s18 = scalar_lea.sflag [#allocation3], %s164_s26  ;;  %s556_s19 = scalar_lea.hbm %s813_s9, 128 }
  0x37   : > { %p557_p0 = scmp.ne.s32.totalorder %s813_s9, %s556_s19  ;;  %p558_p3 = pneg %p819_p13 }
  0x38   : > { %s561_s4 = scalar_lea.hbm %s919_s0, 256  ;;  %p562_p9 = scmp.lt.u32.totalorder %s813_s9, %s919_s0 }
  0x39   : > { %p559_p5 = pnand %p558_p3, %p557_p0  ;;  %p563_p1 = scmp.lt.u32.totalorder %s561_s4, %s556_s19 }
  0x3a   : > { %p565_p4 = scmp.lt.u32.totalorder %s556_s19, %s813_s9 }
  0x3b   : > { %p560_p7 = pneg %p559_p5  ;;  %p564_p2 = por %p563_p1, %p562_p9 }
  0x3d   : > { %p566_p6 = por %p565_p4, %p564_p2 }
  0x3f   : > { %p567_p8 = pnand %p566_p6, %p560_p7 }
  0x41   : > { %570 = shalt.err (!%p567_p8)
}
  0x42   : > { %s571_s26 = scalar_lea.vmem %s815_s10, 128  ;;  %s677_s7 = smov [#allocation2]  }
  0x43   : > { %p572_p12 = scmp.ne.s32.totalorder %s815_s10, %s571_s26  ;;  %s576_s8 = sshll.u32 %s677_s7, 4  ;;  %s577_s8 = int_to_ptr.vmem [resolvable:$false] %s576_s8 }
  0x44   : > { %s578_s21 = scalar_lea.vmem %s577_s8, 256  ;;  %p579_p5 = scmp.lt.s32.totalorder %s815_s10, %s577_s8 }
  0x45   : > { %p574_p11 = pnand %p572_p12, %p558_p3  ;;  %p580_p9 = scmp.lt.s32.totalorder %s578_s21, %s571_s26 }
  0x47   : > { %p575_p0 = pneg %p574_p11  ;;  %p581_p1 = por %p580_p9, %p579_p5 }
  0x49   : > { %p582_p2 = pnand %p581_p1, %p575_p0 }
  0x4b   : > { %585 = shalt.err (!%p582_p2)
}
  0x4c   : > { %465 = dma.hbm_to_vmem [thread:$0]  (!%p819_p13), %s813_s9, 128, %s815_s10, %s165_s18  }
  0x4d   : > { %p937_p7 = scmp.ne.s32.totalorder %s931_s24, 0 }
  0x4e   : > { %s851_s19 = sand.u32 (!%p937_p7), 1, %s656_s13   ;;  %p938_p3 = scmp.ne.s32.totalorder (!%p937_p7), %s929_s22, 0 }
  0x4f   : > { %185 = sbr.rel (%p937_p7) target bundleno = 329 (0x149), region = 32  ;;  %s419_s25 = sshll.u32 (!%p937_p7), %s851_s19, 3 }
  0x50   : > { %s188_s27 = scalar_lea.sflag (!%p937_p7), [#allocation3], %s851_s19  ;;  %s191_s4 = scalar_lea.vmem (!%p937_p7), [#allocation2], %s419_s25 }
  0x56   : > { %639 = dma.done.wait (%p938_p3), %s188_s27, 128  }
  0x57   : > { %641 = vsyncadd (%p938_p3), %s188_s27, 4294967168  ;;  %p939_p4 = scmp.ne.s32.totalorder %s927_s20, 0 }
  0x59   : > { %643 = dma.done.wait (%p939_p4), [#allocation6], 512  }
  0x5a   : > { %645 = vsyncadd (%p939_p4), [#allocation6], 4294966784  ;;  %v678_v0 = vmov 0.0|0.0   ;;  %vm679_vm0 = vmmov 0   ;;  %v680_v1 = vmov 0.0   ;;  %v219_v2 = vld [vmem:[#allocation5] sm:$0xff] }
  0x5b   : > { %444 = vmatprep.subr.bf16.mxu0 %v678_v0  ;;  %441 = vmatprep.mubr.msk.f32.mxu0 %vm679_vm0, %v680_v1  ;;  %v220_v3 = vld [vmem:[#allocation5 + $0x8] sm:$0xff]  ;;  %v221_v4 = vld [vmem:[#allocation5 + $0x10] sm:$0xff]  ;;  %v222_v6 = vld [vmem:[#allocation5 + $0x18] sm:$0xff]  ;;  %vm230_vm1 = vcmask 261120   ;;  %s425_s24 = sshll.u32 %s664_s15, 7  ;;  %s217_s9 = scalar_lea.vmem [#allocation7], %s419_s25 }
  0x5c   : > { %v445_v5 = vpack.c.bf16 %v220_v3, %v219_v2  ;;  %v448_v7 = vpack.c.bf16 %v222_v6, %v221_v4  ;;  %v218_v8 = vld [vmem:[%s191_s4] sm:$0xff]  ;;  %s321_s10 = sshll.u32 %s217_s9, 4  ;;  %vm304_vm2 = vcmask 785408   ;;  %s870_s29 = scalar_lea.hbm %s922_s3, %s425_s24  ;;  %s872_s10 = int_to_ptr.vmem [resolvable:$true] %s321_s10 }
  0x5d   : > { %v422_v9 = vld [vmem:[%s921_s2] ss:$0 sm:$0xff]  ;;  %s307_s6 = scalar_lea.sflag [#allocation4], %s851_s19  ;;  %s586_s26 = scalar_lea.vmem %s872_s10, 128 }
  0x5e   : > { %446 = vmatpush3.bf16.msra.mxu0 %v445_v5  ;;  %p587_p13 = scmp.ne.s32.totalorder %s872_s10, %s586_s26  ;;  %s681_s15 = smov [#allocation7]  }
  0x5f   : > { %447 = vmatprep.subr.bf16.mxu0 %v678_v0  ;;  %s590_s7 = sshll.u32 %s681_s15, 4  ;;  %s591_s7 = int_to_ptr.vmem [resolvable:$false] %s590_s7 }
  0x60   : > { %p588_p6 = pnand %p587_p13, %p798_p10  ;;  %s592_s8 = scalar_lea.vmem %s591_s7, 256 }
  0x61   : > { %p593_p12 = scmp.lt.s32.totalorder %s872_s10, %s591_s7  ;;  %p594_p11 = scmp.lt.s32.totalorder %s592_s8, %s586_s26 }
  0x62   : > { %449 = vmatpush3.bf16.msra.mxu0 %v448_v7  ;;  %p589_p8 = pneg %p588_p6 }
  0x63   : > { %p595_p0 = por %p594_p11, %p593_p12 }
  0x65   : > { %442 = vmatmul.mubr.msk.f32.vlgmr.msra.gmra.mrb[0].mxu0 %vm230_vm1, %v218_v8  ;;  %p596_p5 = pnand %p595_p0, %p589_p8 }
 0x138   : > { %v300_v10 = vpop.f32.mrb[0].mxu0 }
 0x139   : > { %v301_v11 = vadd.f32 %v422_v9, %v300_v10  ;;  %v443_v12 = vpop.f32.mrb[1].mxu0 }
 0x13b   : > { %305 = vst.msk [vmem:[%s217_s9] sm:$0xff] %vm304_vm2, %v301_v11 }
 0x13c   : > { %599 = shalt.err (!%p596_p5)
}
 0x13d   : > { %s600_s21 = scalar_lea.hbm %s870_s29, 128  ;;  %s604_s27 = scalar_lea.hbm %s922_s3, 256 }
 0x13e   : > { %p601_p9 = scmp.ne.s32.totalorder %s870_s29, %s600_s21  ;;  %p605_p7 = scmp.lt.u32.totalorder %s870_s29, %s922_s3 }
 0x13f   : > { %p606_p3 = scmp.lt.u32.totalorder %s604_s27, %s600_s21  ;;  %p608_p13 = scmp.lt.u32.totalorder %s600_s21, %s870_s29 }
 0x140   : > { %p602_p1 = pnand %p601_p9, %p798_p10 }
 0x141   : > { %p607_p4 = por %p606_p3, %p605_p7 }
 0x142   : > { %p603_p2 = pneg %p602_p1 }
 0x143   : > { %p609_p6 = por %p608_p13, %p607_p4 }
 0x145   : > { %p610_p8 = pnand %p609_p6, %p603_p2 }
 0x147   : > { %613 = shalt.err (!%p610_p8)
}
 0x148   : > { %456 = dma.vmem_to_hbm [thread:$0]  (%p798_p10), %s872_s10, 128, %s870_s29, %s307_s6  }
 0x149 PF: > { %s333_s22 = sand.u32 1, %s652_s12   ;;  %p940_p12 = scmp.ne.s32.totalorder %s930_s23, 0 }
 0x14a   : > { %p941_p11 = scmp.ge.s32.totalorder %s672_s17, 2  ;;  %s334_s24 = scalar_lea.sflag [#allocation4], %s333_s22 }
 0x14c   : > { %p467_p0 = pnand %p941_p11, %p940_p12 }
 0x14e   : > { %647 = dma.done.wait (!%p467_p0), %s334_s24, 128  }
 0x14f   : > { %649 = vsyncadd (!%p467_p0), %s334_s24, 4294967168  ;;  %s20_s17 = sadd.s32 1, %s672_s17   ;;  %s942_s12 = smov %s656_s13 }
 0x150   : > { %p17_p5 = scmp.ge.s32.totalorder %s20_s17, 4   ;;  %s943_s13 = smov %s660_s14 }
 0x151   : > { %s944_s14 = smov %s807_s5  ;;  %s945_s15 = smov %s668_s16 }
 0x152   : > { %s946_s16 = smov %s948_s28  ;;  %19 = sbr.rel (!%p17_p5) target bundleno = 7 (0x7), region = 81 }
 0x159   :  { %339 = vsyncpa [#allocation3], 1 }
 0x15a   :  { %341 = vsyncpa [#allocation3 + $0x1], 1 }
 0x15b   :  { %342 = vsyncpa [#allocation6], 1 }
 0x15c   :  { %343 = vsyncpa [#allocation4], 1 }
 0x15d   :  { %345 = vsyncpa [#allocation4 + $0x1], 1 }

</bundles_post_ra>
